<compile_context>
chip_gen: v5e
topology: v5e:2x2
jax: 0.10.0
libtpu: 0.0.40
codegen_flags: <defaults>
</compile_context>

<pallas_src>
import jax
import jax.numpy as jnp
from jax.experimental import pallas as pl
from jax.experimental.pallas import tpu as pltpu

_LANE = 128                         # vreg lane width
_MAX_LANE = 4096                    # widest lane-dense row we target
_TARGET_TILE_BYTES = 2 * 1024 * 1024  # ~2 MiB tile: 4x that (double-buffered
                                       # in + out) stays under v5e's 16 MiB
                                       # scoped-VMEM default.


# ----------------------------------------------------------------------------
# Primary path: pure HBM -> HBM DMA copy (no VMEM round trip, no grid).
# ----------------------------------------------------------------------------
def _dma_copy_kernel(x_hbm, o_hbm, sem):
    cp = pltpu.make_async_copy(x_hbm, o_hbm, sem)
    cp.start()
    cp.wait()


def identity_copy(x: jax.Array) -> jax.Array:
    """Identity copy as a single HBM->HBM DMA (the structural win from the
    perf review): no VMEM bounce, no padding, works for any shape/dtype."""
    return pl.pallas_call(
        _dma_copy_kernel,
        out_shape=jax.ShapeDtypeStruct(x.shape, x.dtype),
        in_specs=[pl.BlockSpec(memory_space=pl.ANY)],
        out_specs=pl.BlockSpec(memory_space=pl.ANY),
        scratch_shapes=[pltpu.SemaphoreType.DMA],
    )(x)


# ----------------------------------------------------------------------------
# Secondary path: pipelined VMEM-resident tiled copy (template for fused work).
# ----------------------------------------------------------------------------
def _copy_kernel(x_ref, o_ref):
    o_ref[...] = x_ref[...]


def identity_copy_tiled(x: jax.Array) -> jax.Array:
    """Lane-dense, large-tile, pipelined identity copy through VMEM."""
    orig_shape = x.shape
    total = x.size
    itemsize = x.dtype.itemsize
    # dtype-dependent minimum sublane tile: f32 -> 8, bf16 -> 16, int8/fp8 -> 32
    sub = max(8, 32 // max(itemsize, 1))

    # Widen the lane dimension (multiple of 128, up to 4096) as long as it
    # divides `total` (so widening never introduces padding) and still leaves
    # at least `sub` rows.
    lane = _LANE
    while (lane * 2 <= _MAX_LANE
           and total % (lane * 2) == 0
           and total // (lane * 2) >= sub):
        lane *= 2

    rows = pl.cdiv(total, lane)
    rows_p = max(rows, sub)          # tiny inputs: pad up to one full min-tile
    padded = rows_p * lane

    flat = x.reshape(-1)
    if padded != total:
        # TODO(synk): ragged tail handled by a single pad/slice here; the
        # production-preferred path is identity_copy (pure DMA, no padding).
        flat = jnp.pad(flat, (0, padded - total))
    flat2d = flat.reshape(rows_p, lane)

    # Fixed large tile (~2 MiB), multiple of the sublane requirement; the
    # last grid block may be partial (Pallas masks it). No divisor search.
    tile = max(sub, ((_TARGET_TILE_BYTES // (lane * itemsize)) // sub) * sub)
    tile = min(tile, (rows_p // sub) * sub)
    grid = (pl.cdiv(rows_p, tile),)

    out = pl.pallas_call(
        _copy_kernel,
        out_shape=jax.ShapeDtypeStruct((rows_p, lane), x.dtype),
        grid=grid,
        in_specs=[pl.BlockSpec((tile, lane), lambda i: (i, 0))],
        out_specs=pl.BlockSpec((tile, lane), lambda i: (i, 0)),
        compiler_params=pltpu.CompilerParams(
            dimension_semantics=("parallel",)),
    )(flat2d)

    out_flat = out.reshape(-1)
    if padded != total:
        out_flat = out_flat[:total]
    return out_flat.reshape(orig_shape)


# ----------------------------------------------------------------------------
# Module mirror.
# ----------------------------------------------------------------------------
class FFConvDiscriminator:
    """JAX/Pallas mirror of the (empty) PyTorch FFConvDiscriminator."""

    def __init__(self):
        # TODO(synk): reference __init__ body is empty (`pass`); there are no
        # weights, conv layers, or buffers to initialize.
        pass

    def forward(self, x: jax.Array):
        # TODO(synk): reference forward body is empty (`pass`) and returns
        # None; no compute exists to lower, so no kernel is launched here.
        del x
        return None

    def __call__(self, x):
        return self.forward(x)


if __name__ == "__main__":
    key = jax.random.PRNGKey(0)
    # Small NCHW input consistent with a conv-style discriminator interface.
    x = jax.random.normal(key, (2, 4, 16, 16), dtype=jnp.float32)

    # Primary optimized kernel: direct HBM->HBM DMA copy.
    y = identity_copy(x)
    jax.block_until_ready(y)
    assert y.shape == x.shape and y.dtype == x.dtype
    assert bool(jnp.array_equal(y, x)), "DMA identity kernel mismatch"

    # Secondary pipelined VMEM-resident copy (large lane-dense tiles).
    y2 = identity_copy_tiled(x)
    jax.block_until_ready(y2)
    assert y2.shape == x.shape and y2.dtype == x.dtype
    assert bool(jnp.array_equal(y2, x)), "tiled identity kernel mismatch"

    # Exact forward semantics of the reference module: returns None,
    # with no kernel launch / HBM traffic inside forward().
    model = FFConvDiscriminator()
    out = model(x)
    assert out is None

    print("KERNEL_OK")
</pallas_src>

<mosaic_0001>
module attributes {stable_mosaic.version = 11 : i64} {
  func.func @_dma_copy_kernel(%arg0: memref<2x4x16x16xf32, #tpu.memory_space<any>>, %arg1: memref<2x4x16x16xf32, #tpu.memory_space<any>>, %arg2: memref<!tpu.dma_semaphore, #tpu.memory_space<semaphore_mem>>) attributes {dimension_semantics = [], scalar_prefetch = 0 : i64, scratch_operands = 1 : i64, tpu.core_type = #tpu.core_type<tc>} {
    tpu.enqueue_dma source(%arg0 : memref<2x4x16x16xf32, #tpu.memory_space<any>>) target(%arg1 : memref<2x4x16x16xf32, #tpu.memory_space<any>>) target_semaphore(%arg2 : memref<!tpu.dma_semaphore, #tpu.memory_space<semaphore_mem>>)
    tpu.wait_dma2 semaphore(%arg2 : memref<!tpu.dma_semaphore, #tpu.memory_space<semaphore_mem>>) src(%arg0 : memref<2x4x16x16xf32, #tpu.memory_space<any>>) dst(%arg1 : memref<2x4x16x16xf32, #tpu.memory_space<any>>)
    return
  }
}

</mosaic_0001>

<bundles_post_ra>
// kernel: tpu_custom_call.1
= control target key start
LH: loop header
LB: loop body
LE: loop exit
PB: predicated region body
PF: predicated region fallthrough
CT: control target
= control target key end

     0   :  { %s34_s12 = smov [#allocation2]   ;;  %s35_s13 = smov [#allocation3]   ;;  %s53_s0 = inlined_call_operand.hbm [shape: f32[2,4,16,16], index: 0, kind: input, shape index: {}]   ;;  %s54_s1 = inlined_call_operand.hbm [shape: f32[2,4,16,16], index: 1, kind: output, shape index: {}]  }
   0x1   :  { %s10_s8 = sshll.u32 %s53_s0, 4  ;;  %s12_s11 = sshll.u32 %s54_s1, 4  ;;  %s11_s8 = int_to_ptr.hbm [resolvable:$true] %s10_s8  ;;  %s13_s11 = int_to_ptr.hbm [resolvable:$true] %s12_s11 }
   0x2   :  { %s36_s14 = smov 0  }
   0x3   :  { %16 = dma.general %s11_s8, 2048, %s13_s11, %s34_s12, %s35_s13, [#allocation4], %s36_s14, 0  }
   0x4   :  { %32 = dma.done.wait [#allocation2], 2048 }
   0x5   :  { %33 = vsyncadd [#allocation2], 4294965248 }
   0x6   :  { %22 = vsyncmov [#allocation2] }
   0x9   :  { %s23_s15 = vpop.sfrf %22 }
   0xa   :  { %p28_p0 = scmp.ne.s32.totalorder %s23_s15, 0 }
   0xc   :  { %27 = shalt.err (%p28_p0)  }

</bundles_post_ra>
